<compile_context>
chip_gen: v5e
topology: v5e:2x2
jax: 0.10.0
libtpu: 0.0.40
codegen_flags: <defaults>
</compile_context>

<pallas_src>
import jax
import jax.numpy as jnp
from jax.experimental import pallas as pl
from jax.experimental.pallas import tpu as pltpu


def _round_up(x: int, m: int) -> int:
    return ((x + m - 1) // m) * m


def perceptron_kernel(x_ref, w1_ref, b1_ref, w2_ref, b2_ref, o_ref):
    # layer1: bf16 operands -> MXU, f32 accumulate, then f32 bias add (VPU).
    h = jnp.dot(x_ref[...], w1_ref[...], preferred_element_type=jnp.float32)
    h = h + b1_ref[...]                 # b1 is [1, hidden] -> broadcasts over batch
    # sigmoid in f32 (goes to the EUP slot; keep f32 for v5e compatibility).
    h = jax.nn.sigmoid(h)
    # layer2: cast activations to bf16 only for the MXU operand; f32 accumulate.
    y = jnp.dot(h.astype(jnp.bfloat16), w2_ref[...],
                preferred_element_type=jnp.float32)
    y = y + b2_ref[...]                 # b2 is [1, out] -> broadcasts over batch
    o_ref[...] = y.astype(o_ref.dtype)


def perceptron_forward(x, w1, b1, w2, b2, *, block_b=512):
    """x: [B, in], w1: [in, hidden], b1: [hidden], w2: [hidden, out], b2: [out]."""
    B, in_num = x.shape
    hidden = w1.shape[1]
    out_num = w2.shape[1]

    # bf16 matmul operands (halves DMA bytes and vreg pressure, full MXU rate);
    # biases stay f32 and are added after the f32-accumulated matmul.
    xb = x.astype(jnp.bfloat16)
    w1b = w1.astype(jnp.bfloat16)
    w2b = w2.astype(jnp.bfloat16)
    b1f = b1.reshape(1, hidden).astype(jnp.float32)
    b2f = b2.reshape(1, out_num).astype(jnp.float32)

    # Batch tile: multiple of 8 sublanes, capped by block_b.
    tb = min(block_b, _round_up(B, 8))
    tb = _round_up(tb, 8)
    b_padded = _round_up(B, tb)
    if b_padded != B:
        xb = jnp.pad(xb, ((0, b_padded - B), (0, 0)))

    grid = (b_padded // tb,)

    out = pl.pallas_call(
        perceptron_kernel,
        out_shape=jax.ShapeDtypeStruct((b_padded, out_num), jnp.float32),
        grid=grid,
        in_specs=[
            # Activations stream over the batch grid axis.
            pl.BlockSpec((tb, in_num), lambda i: (i, 0)),
            # Weights / biases stay resident in VMEM across all grid steps.
            pl.BlockSpec((in_num, hidden), lambda i: (0, 0)),
            pl.BlockSpec((1, hidden), lambda i: (0, 0)),
            pl.BlockSpec((hidden, out_num), lambda i: (0, 0)),
            pl.BlockSpec((1, out_num), lambda i: (0, 0)),
        ],
        out_specs=pl.BlockSpec((tb, out_num), lambda i: (i, 0)),
        compiler_params=pltpu.CompilerParams(
            dimension_semantics=("parallel",)),   # megacore-shard batch on v7x
    )(xb, w1b, b1f, w2b, b2f)

    return out[:B] if b_padded != B else out


if __name__ == "__main__":
    # Deterministic synthetic parameters (mirrors torch.randn init in Linear).
    in_num, hidden_num, out_num = 32, 64, 16
    batch = 256  # large enough to exercise batch tiling (grid of 2 with TB=128)

    key = jax.random.PRNGKey(0)
    kx, kw1, kb1, kw2, kb2 = jax.random.split(key, 5)

    x = jax.random.normal(kx, (batch, in_num), dtype=jnp.float32)
    w1 = jax.random.normal(kw1, (in_num, hidden_num), dtype=jnp.float32)
    b1 = jax.random.normal(kb1, (hidden_num,), dtype=jnp.float32)
    w2 = jax.random.normal(kw2, (hidden_num, out_num), dtype=jnp.float32)
    b2 = jax.random.normal(kb2, (out_num,), dtype=jnp.float32)

    out = perceptron_forward(x, w1, b1, w2, b2, block_b=128)
    out = jax.block_until_ready(out)

    # Reference in plain f32 JAX (same math as the PyTorch forward).
    # Tolerance loosened because matmul operands are bf16 (f32 accumulation).
    ref = jax.nn.sigmoid(x @ w1 + b1) @ w2 + b2
    assert out.shape == ref.shape, f"shape mismatch {out.shape} vs {ref.shape}"
    assert jnp.allclose(out, ref, atol=2.5e-1, rtol=2.5e-2), "mismatch vs reference"

    print("KERNEL_OK")
</pallas_src>

<mosaic_0001>
module attributes {stable_mosaic.version = 11 : i64} {
  func.func @perceptron_kernel(%arg0: i32, %arg1: memref<128x32xbf16, #tpu.memory_space<vmem>>, %arg2: memref<32x64xbf16, #tpu.memory_space<vmem>>, %arg3: memref<1x64xf32, #tpu.memory_space<vmem>>, %arg4: memref<64x16xbf16, #tpu.memory_space<vmem>>, %arg5: memref<1x16xf32, #tpu.memory_space<vmem>>, %arg6: memref<128x16xf32, #tpu.memory_space<vmem>>) attributes {dimension_semantics = [#tpu.dimension_semantics<parallel>], iteration_bounds = array<i64: 2>, scalar_prefetch = 0 : i64, scratch_operands = 0 : i64, tpu.core_type = #tpu.core_type<tc>, window_params = [{transform_indices = @transform_0, window_bounds = array<i64: 128, 32>}, {pipeline_mode = #tpu.pipeline_mode<synchronous>, transform_indices = @transform_1, window_bounds = array<i64: 32, 64>}, {pipeline_mode = #tpu.pipeline_mode<synchronous>, transform_indices = @transform_2, window_bounds = array<i64: 1, 64>}, {pipeline_mode = #tpu.pipeline_mode<synchronous>, transform_indices = @transform_3, window_bounds = array<i64: 64, 16>}, {pipeline_mode = #tpu.pipeline_mode<synchronous>, transform_indices = @transform_4, window_bounds = array<i64: 1, 16>}, {transform_indices = @transform_5, window_bounds = array<i64: 128, 16>}]} {
    %c0 = arith.constant 0 : index
    %c0_0 = arith.constant 0 : index
    %0 = vector.load %arg1[%c0, %c0_0] : memref<128x32xbf16, #tpu.memory_space<vmem>>, vector<128x32xbf16>
    %c0_1 = arith.constant 0 : index
    %c0_2 = arith.constant 0 : index
    %1 = vector.load %arg2[%c0_1, %c0_2] : memref<32x64xbf16, #tpu.memory_space<vmem>>, vector<32x64xbf16>
    %cst = arith.constant dense<0.000000e+00> : vector<128x64xf32>
    %2 = tpu.matmul %0, %1, %cst {dimension_numbers = #tpu.dot_dimension_numbers<[1], [0], [0], [1], [0, 0, 1, 1], [], []>} : vector<128x32xbf16>, vector<32x64xbf16>, vector<128x64xf32> -> vector<128x64xf32>
    %c0_3 = arith.constant 0 : index
    %c0_4 = arith.constant 0 : index
    %3 = vector.load %arg3[%c0_3, %c0_4] : memref<1x64xf32, #tpu.memory_space<vmem>>, vector<1x64xf32>
    %4 = vector.broadcast %3 : vector<1x64xf32> to vector<128x64xf32>
    %5 = arith.addf %2, %4 : vector<128x64xf32>
    %6 = arith.negf %5 : vector<128x64xf32>
    %7 = math.exp %6 : vector<128x64xf32>
    %cst_5 = arith.constant 1.000000e+00 : f32
    %8 = vector.broadcast %cst_5 : f32 to vector<128x64xf32>
    %9 = arith.addf %8, %7 : vector<128x64xf32>
    %10 = arith.divf %8, %9 : vector<128x64xf32>
    %11 = arith.truncf %10 : vector<128x64xf32> to vector<128x64xbf16>
    %c0_6 = arith.constant 0 : index
    %c0_7 = arith.constant 0 : index
    %12 = vector.load %arg4[%c0_6, %c0_7] : memref<64x16xbf16, #tpu.memory_space<vmem>>, vector<64x16xbf16>
    %cst_8 = arith.constant dense<0.000000e+00> : vector<128x16xf32>
    %13 = tpu.matmul %11, %12, %cst_8 {dimension_numbers = #tpu.dot_dimension_numbers<[1], [0], [0], [1], [0, 0, 1, 1], [], []>} : vector<128x64xbf16>, vector<64x16xbf16>, vector<128x16xf32> -> vector<128x16xf32>
    %c0_9 = arith.constant 0 : index
    %c0_10 = arith.constant 0 : index
    %14 = vector.load %arg5[%c0_9, %c0_10] : memref<1x16xf32, #tpu.memory_space<vmem>>, vector<1x16xf32>
    %15 = vector.broadcast %14 : vector<1x16xf32> to vector<128x16xf32>
    %16 = arith.addf %13, %15 : vector<128x16xf32>
    %c0_11 = arith.constant 0 : index
    %c0_12 = arith.constant 0 : index
    %17 = vector.load %arg6[%c0_11, %c0_12] : memref<128x16xf32, #tpu.memory_space<vmem>>, vector<128x16xf32>
    tpu.vector_store %arg6[%c0_11, %c0_12], %16 {strides = array<i32>} : memref<128x16xf32, #tpu.memory_space<vmem>>, vector<128x16xf32>,
    return
  }
  func.func @transform_0(%arg0: i32) -> (i32, i32) {
    %c0_i32 = arith.constant 0 : i32
    %c0_i32_0 = arith.constant 0 : i32
    return %arg0, %c0_i32 : i32, i32
  }
  func.func @transform_1(%arg0: i32) -> (i32, i32) {
    %c0_i32 = arith.constant 0 : i32
    %c0_i32_0 = arith.constant 0 : i32
    %c0_i32_1 = arith.constant 0 : i32
    return %c0_i32, %c0_i32_0 : i32, i32
  }
  func.func @transform_2(%arg0: i32) -> (i32, i32) {
    %c0_i32 = arith.constant 0 : i32
    %c0_i32_0 = arith.constant 0 : i32
    %c0_i32_1 = arith.constant 0 : i32
    return %c0_i32, %c0_i32_0 : i32, i32
  }
  func.func @transform_3(%arg0: i32) -> (i32, i32) {
    %c0_i32 = arith.constant 0 : i32
    %c0_i32_0 = arith.constant 0 : i32
    %c0_i32_1 = arith.constant 0 : i32
    return %c0_i32, %c0_i32_0 : i32, i32
  }
  func.func @transform_4(%arg0: i32) -> (i32, i32) {
    %c0_i32 = arith.constant 0 : i32
    %c0_i32_0 = arith.constant 0 : i32
    %c0_i32_1 = arith.constant 0 : i32
    return %c0_i32, %c0_i32_0 : i32, i32
  }
  func.func @transform_5(%arg0: i32) -> (i32, i32) {
    %c0_i32 = arith.constant 0 : i32
    %c0_i32_0 = arith.constant 0 : i32
    return %arg0, %c0_i32 : i32, i32
  }
}

</mosaic_0001>

<bundles_post_ra>
// kernel: tpu_custom_call.1
= control target key start
LH: loop header
LB: loop body
LE: loop exit
PB: predicated region body
PF: predicated region fallthrough
CT: control target
= control target key end

     0   :  { %s1105_s18 = smov 0   ;;  %s1339_s0 = inlined_call_operand.vmem [shape: bf16[256,32], index: 0, kind: input, shape index: {}]   ;;  %s1340_s1 = inlined_call_operand.vmem [shape: bf16[32,64], index: 1, kind: input, shape index: {}]   ;;  %s1341_s2 = inlined_call_operand.vmem [shape: f32[1,64], index: 2, kind: input, shape index: {}]   ;;  %s1342_s3 = inlined_call_operand.vmem [shape: bf16[64,16], index: 3, kind: input, shape index: {}]   ;;  %s1343_s4 = inlined_call_operand.vmem [shape: f32[1,16], index: 4, kind: input, shape index: {}]   ;;  %s1344_s5 = inlined_call_operand.vmem [shape: f32[256,16], index: 5, kind: output, shape index: {}]  }
   0x1 LB: > { %s874_s19 = sadd.s32 4294967295, %s1073_s18   ;;  %p878_p0 = scmp.ge.s32.totalorder %s1073_s18, 1  ;;  %s1073_s18 = sphi %s1105_s18, %s15_s18  }
   0x2   : > { %p188_p1 = scmp.lt.s32.totalorder %s1073_s18, 3 }
   0x4   : > { %p189_p2 = pnand %p878_p0, %p188_p1 }
   0x5   : > { %s879_s22 = sshll.u32 (!%p189_p2), %s874_s19, 4 }
   0x6   : > { %192 = sbr.rel (%p189_p2) target bundleno = 440 (0x1b8), region = 40  ;;  %p217_p3 = scmp.lt.s32.totalorder (!%p189_p2), %s879_s22, 31 }
   0xb   : > { %v982_v0 = vld [vmem:[%s1340_s1 + $0x8] sm:$0xff]  ;;  %v981_v1 = vld [vmem:[%s1340_s1] sm:$0xff]  ;;  %s1358_s22 = smov (!%p217_p3, %s879_s22), 31  ;;  %vm305_vm0 = vcmask 261120   ;;  %v986_v10 = vld [vmem:[%s1342_s3 + $0x18] sm:$0xff]  ;;  %vm727_vm9 = vcmask 523264  }
   0xc   : > { %336 = vmatpush.bf16.msra.mxu0 %v982_v0  ;;  %987 = vmatpush.bf16.msra.mxu3 %v982_v0  ;;  %s880_s25 = sshll.u32 %s1358_s22, 2  ;;  %v985_v11 = vld [vmem:[%s1342_s3 + $0x10] sm:$0xff]  ;;  %v1142_v12 = vld [vmem:[%s1341_s2] ss:$0 sm:$0xff]  ;;  %v984_v14 = vld [vmem:[%s1342_s3 + $0x8] sm:$0xff]  ;;  %s882_s14 = sshll.u32 %s1358_s22, 3 }
   0xd   : > { %s220_s28 = scalar_lea.vmem %s1339_s0, %s880_s25  ;;  %756 = vmatpush.bf16.msra.mxu1 %v986_v10  ;;  %989 = vmatpush.bf16.msra.mxu2 %v986_v10  ;;  %v983_v17 = vld [vmem:[%s1342_s3] sm:$0xff]  ;;  %s1302_s20 = scalar_lea.vmem %s1344_s5, %s882_s14 }
   0xe   : > { %v973_v2 = vld [vmem:[%s220_s28] sm:$0xff]  ;;  %v974_v3 = vld [vmem:[%s220_s28 + $0x8] sm:$0xff]  ;;  %v975_v5 = vld [vmem:[%s220_s28 + $0x10] sm:$0xff] }
   0xf   : > { %v978_v4 = vld [vmem:[%s220_s28 + $0x28] sm:$0xff]  ;;  %v979_v6 = vld [vmem:[%s220_s28 + $0x30] sm:$0xff]  ;;  %v976_v7 = vld [vmem:[%s220_s28 + $0x18] sm:$0xff] }
  0x10   : > { %337 = vmatpush.bf16.msra.mxu0 %v981_v1  ;;  %988 = vmatpush.bf16.msra.mxu3 %v981_v1  ;;  %v980_v8 = vld [vmem:[%s220_s28 + $0x38] sm:$0xff]  ;;  %v977_v9 = vld [vmem:[%s220_s28 + $0x20] sm:$0xff] }
  0x11   : > { %757 = vmatpush.bf16.msra.mxu1 %v985_v11  ;;  %990 = vmatpush.bf16.msra.mxu2 %v985_v11 }
  0x13   : > { %923 = vmatmul.msk.bf16.vlgmr.msra.gmra.mxu0 %vm305_vm0, %v973_v2  ;;  %928 = vmatmul.msk.bf16.vlgmr.msra.gmra.mxu3 %vm305_vm0, %v978_v4 }
  0x15   : > { %758 = vmatpush.bf16.msra.mxu1 %v984_v14  ;;  %991 = vmatpush.bf16.msra.mxu2 %v984_v14 }
  0x19   : > { %759 = vmatpush.bf16.msra.mxu1 %v983_v17  ;;  %992 = vmatpush.bf16.msra.mxu2 %v983_v17 }
  0x23   : > { %924 = vmatmul.msk.bf16.gmra.mxu0 %vm305_vm0, %v974_v3  ;;  %929 = vmatmul.msk.bf16.gmra.mxu3 %vm305_vm0, %v979_v6 }
  0x33   : > { %925 = vmatmul.msk.bf16.gmra.mxu0 %vm305_vm0, %v975_v5  ;;  %930 = vmatmul.msk.bf16.gmra.mxu3 %vm305_vm0, %v980_v8 }
  0x43   : > { %926 = vmatmul.msk.bf16.gmra.mxu0 %vm305_vm0, %v976_v7 }
  0x53   : > { %927 = vmatmul.msk.bf16.gmra.mxu0 %vm305_vm0, %v977_v9 }
  0x90   : > { %v339_v13 = vpop.f32.mrf.mxu0 }
  0x91   : > { %v340_v15 = vadd.f32 %v1142_v12, %v339_v13 }
  0x93   : > { %v931_v16 = vmul.f32 -1.442695, %v340_v15 }
  0x95   : > { %1003 = vpow2.f32 %v931_v16 }
  0x96   : > { %v364_v7 = vpop.f32.mrf.mxu3 }
  0x98   : > { %v341_v18 = vpop.f32.mrf.mxu0 }
  0x99   : > { %v342_v19 = vadd.f32 %v1142_v12, %v341_v18 }
  0x9b   : > { %v1004_v20 = vpop.eup %1003  ;;  %v932_v21 = vmul.f32 -1.442695, %v342_v19 }
  0x9c   : > { %v427_v22 = vadd.f32 1.0, %v1004_v20 }
  0x9d   : > { %1005 = vpow2.f32 %v932_v21 }
  0x9e   : > { %1007 = vrcp.f32 %v427_v22  ;;  %vm448_vm2 = vweird.f32 %v427_v22  ;;  %v452_v42 = vand.u32 2147483647, %v427_v22  ;;  %v454_v43 = vand.u32 2147483648, %v427_v22 }
  0xa0   : > { %v344_v23 = vpop.f32.mrf.mxu0  ;;  %vm453_vm6 = vcmp.eq.f32.partialorder %v452_v42, 8.507059e+37  ;;  %v455_v55 = vor.u32 1.1754944e-38, %v454_v43 }
  0xa1   : > { %v345_v24 = vadd.f32 %v1142_v12, %v344_v23 }
  0xa3   : > { %v1006_v25 = vpop.eup %1005  ;;  %v933_v26 = vmul.f32 -1.442695, %v345_v24 }
  0xa4   : > { %v1008_v27 = vpop.eup %1007  ;;  %v428_v28 = vadd.f32 1.0, %v1006_v25 }
  0xa5   : > { %v444_v29 = vmul.f32 %v1008_v27, %v427_v22  ;;  %1009 = vpow2.f32 %v933_v26  ;;  %vm449_vm1 = vweird.f32 %v1008_v27 }
  0xa6   : > { %1011 = vrcp.f32 %v428_v28  ;;  %v469_v44 = vand.u32 2147483648, %v428_v28  ;;  %v467_v47 = vand.u32 2147483647, %v428_v28  ;;  %vm1158_vm4 = vmor %vm448_vm2, %vm449_vm1  ;;  %vm463_vm5 = vweird.f32 %v428_v28 }
  0xa7   : > { %v445_v30 = vsub.f32 1.0, %v444_v29 }
  0xa8   : > { %v346_v31 = vpop.f32.mrf.mxu0  ;;  %v470_v56 = vor.u32 1.1754944e-38, %v469_v44  ;;  %vm468_vm8 = vcmp.eq.f32.partialorder %v467_v47, 8.507059e+37 }
  0xa9   : > { %v347_v32 = vadd.f32 %v1142_v12, %v346_v31  ;;  %v446_v35 = vmul.f32 %v1008_v27, %v445_v30 }
  0xab   : > { %v1010_v33 = vpop.eup %1009  ;;  %v934_v34 = vmul.f32 -1.442695, %v347_v32  ;;  %v447_v39 = vadd.f32 %v1008_v27, %v446_v35 }
  0xac   : > { %v1012_v36 = vpop.eup %1011  ;;  %v1154_v37 = vadd.f32 1.0, %v1010_v33 }
  0xad   : > { %v459_v38 = vmul.f32 %v1012_v36, %v428_v28  ;;  %1013 = vpow2.f32 %v934_v34  ;;  %vm464_vm3 = vweird.f32 %v1012_v36  ;;  %v451_v51 = vsel %vm1158_vm4, %v1008_v27, %v447_v39  ;;  %v366_v34 = vpop.f32.mrf.mxu3 }
  0xae   : > { %1015 = vrcp.f32 %v1154_v37  ;;  %vm465_vm7 = vmor %vm463_vm5, %vm464_vm3  ;;  %v456_v59 = vsel %vm453_vm6, %v455_v55, %v451_v51  ;;  %vm478_vm11 = vweird.f32 %v1154_v37  ;;  %v482_v11 = vand.u32 2147483647, %v1154_v37 }
  0xaf   : > { %v460_v40 = vsub.f32 1.0, %v459_v38  ;;  %v484_v13 = vand.u32 2147483648, %v1154_v37  ;;  %v367_v44 = vadd.f32 %v1142_v12, %v366_v34 }
  0xb0   : > { %v349_v41 = vpop.f32.mrf.mxu0  ;;  %vm483_vm15 = vcmp.eq.f32.partialorder %v482_v11, 8.507059e+37 }
  0xb1   : > { %v350_v45 = vadd.f32 %v1142_v12, %v349_v41  ;;  %v461_v46 = vmul.f32 %v1012_v36, %v460_v40  ;;  %v485_v25 = vor.u32 1.1754944e-38, %v484_v13 }
  0xb3   : > { %v1014_v49 = vpop.eup %1013  ;;  %v935_v50 = vmul.f32 -1.442695, %v350_v45  ;;  %v462_v52 = vadd.f32 %v1012_v36, %v461_v46 }
  0xb4   : > { %v1016_v53 = vpop.eup %1015  ;;  %v430_v54 = vadd.f32 1.0, %v1014_v49 }
  0xb5   : > { %v474_v57 = vmul.f32 %v1016_v53, %v1154_v37  ;;  %1017 = vpow2.f32 %v935_v50  ;;  %v466_v58 = vsel %vm465_vm7, %v1012_v36, %v462_v52  ;;  %vm479_vm10 = vweird.f32 %v1016_v53 }
  0xb6   : > { %1019 = vrcp.f32 %v430_v54  ;;  %v471_v60 = vsel %vm468_vm8, %v470_v56, %v466_v58  ;;  %v499_v14 = vand.u32 2147483648, %v430_v54  ;;  %v497_v17 = vand.u32 2147483647, %v430_v54  ;;  %vm1174_vm13 = vmor %vm478_vm11, %vm479_vm10  ;;  %v369_v56 = vpop.f32.mrf.mxu3 }
  0xb7   : > { %v683_v61 = vpack.c.bf16 %v471_v60, %v456_v59  ;;  %v475_v62 = vsub.f32 1.0, %v474_v57  ;;  %vm493_vm14 = vweird.f32 %v430_v54  ;;  %v365_v36 = vadd.f32 %v1142_v12, %v364_v7 }
  0xb8   : > { %v351_v63 = vpop.f32.mrf.mxu0  ;;  %v500_v26 = vor.u32 1.1754944e-38, %v499_v14  ;;  %vm498_vm1 = vcmp.eq.f32.partialorder %v497_v17, 8.507059e+37 }
  0xb9   : > { %v352_v0 = vadd.f32 %v1142_v12, %v351_v63  ;;  %963 = vmatmul.msk.bf16.vlgmr.msra.gmra.mxu1 %vm727_vm9, %v683_v61  ;;  %v476_v3 = vmul.f32 %v1016_v53, %v475_v62  ;;  %v941_v43 = vmul.f32 -1.442695, %v365_v36 }
  0xbb   : > { %v1018_v1 = vpop.eup %1017  ;;  %v936_v2 = vmul.f32 -1.442695, %v352_v0  ;;  %v477_v8 = vadd.f32 %v1016_v53, %v476_v3 }
  0xbc   : > { %v1020_v4 = vpop.eup %1019  ;;  %v1167_v5 = vadd.f32 1.0, %v1018_v1 }
  0xbd   : > { %v489_v6 = vmul.f32 %v1020_v4, %v430_v54  ;;  %1021 = vpow2.f32 %v936_v2  ;;  %vm494_vm12 = vweird.f32 %v1020_v4  ;;  %v481_v21 = vsel %vm1174_vm13, %v1016_v53, %v477_v8 }
  0xbe   : > { %1023 = vrcp.f32 %v1167_v5  ;;  %vm495_vm0 = vmor %vm493_vm14, %vm494_vm12  ;;  %v486_v29 = vsel %vm483_vm15, %v485_v25, %v481_v21  ;;  %vm508_vm3 = vweird.f32 %v1167_v5  ;;  %v512_v48 = vand.u32 2147483647, %v1167_v5 }
  0xbf   : > { %v490_v9 = vsub.f32 1.0, %v489_v6  ;;  %v514_v49 = vand.u32 2147483648, %v1167_v5  ;;  %v942_v54 = vmul.f32 -1.442695, %v367_v44 }
  0xc0   : > { %v354_v10 = vpop.f32.mrf.mxu0  ;;  %vm513_vm7 = vcmp.eq.f32.partialorder %v512_v48, 8.507059e+37 }
  0xc1   : > { %v355_v15 = vadd.f32 %v1142_v12, %v354_v10  ;;  %v491_v16 = vmul.f32 %v1020_v4, %v490_v9  ;;  %v515_v63 = vor.u32 1.1754944e-38, %v514_v49 }
  0xc3   : > { %v1022_v19 = vpop.eup %1021  ;;  %v937_v20 = vmul.f32 -1.442695, %v355_v15  ;;  %v492_v22 = vadd.f32 %v1020_v4, %v491_v16  ;;  %v371_v16 = vpop.f32.mrf.mxu3 }
  0xc4   : > { %v1180_v23 = vpop.eup %1023  ;;  %v432_v24 = vadd.f32 1.0, %v1022_v19 }
  0xc5   : > { %v504_v27 = vmul.f32 %v1180_v23, %v1167_v5  ;;  %1025 = vpow2.f32 %v937_v20  ;;  %v496_v28 = vsel %vm495_vm0, %v1020_v4, %v492_v22  ;;  %vm509_vm2 = vweird.f32 %v1180_v23 }
  0xc6   : > { %1027 = vrcp.f32 %v432_v24  ;;  %v501_v30 = vsel %vm498_vm1, %v500_v26, %v496_v28  ;;  %v529_v50 = vand.u32 2147483648, %v432_v24  ;;  %v527_v53 = vand.u32 2147483647, %v432_v24  ;;  %vm1198_vm5 = vmor %vm508_vm3, %vm509_vm2 }
  0xc7   : > { %v684_v31 = vpack.c.bf16 %v501_v30, %v486_v29  ;;  %v505_v32 = vsub.f32 1.0, %v504_v27  ;;  %vm523_vm6 = vweird.f32 %v432_v24  ;;  %v370_v22 = vadd.f32 %v1142_v12, %v369_v56 }
  0xc8   : > { %v356_v33 = vpop.f32.mrf.mxu0  ;;  %v530_v0 = vor.u32 1.1754944e-38, %v529_v50  ;;  %vm528_vm10 = vcmp.eq.f32.partialorder %v527_v53, 8.507059e+37 }
  0xc9   : > { %v357_v35 = vadd.f32 %v1142_v12, %v356_v33  ;;  %964 = vmatmul.msk.bf16.gmra.mxu1 %vm727_vm9, %v684_v31  ;;  %v506_v39 = vmul.f32 %v1180_v23, %v505_v32  ;;  %v372_v31 = vadd.f32 %v1142_v12, %v371_v16  ;;  %v943_v36 = vmul.f32 -1.442695, %v370_v22 }
  0xcb   : > { %v1026_v37 = vpop.eup %1025  ;;  %v938_v38 = vmul.f32 -1.442695, %v357_v35  ;;  %v507_v45 = vadd.f32 %v1180_v23, %v506_v39  ;;  %v944_v44 = vmul.f32 -1.442695, %v372_v31 }
  0xcc   : > { %v1028_v40 = vpop.eup %1027  ;;  %v1188_v41 = vadd.f32 1.0, %v1026_v37 }
  0xcd   : > { %v519_v42 = vmul.f32 %v1028_v40, %v432_v24  ;;  %1029 = vpow2.f32 %v938_v38  ;;  %vm524_vm4 = vweird.f32 %v1028_v40  ;;  %v511_v59 = vsel %vm1198_vm5, %v1180_v23, %v507_v45 }
  0xce   : > { %1031 = vrcp.f32 %v1188_v41  ;;  %vm525_vm8 = vmor %vm523_vm6, %vm524_vm4  ;;  %v516_v3 = vsel %vm513_vm7, %v515_v63, %v511_v59  ;;  %vm538_vm12 = vweird.f32 %v1188_v41  ;;  %v544_v23 = vand.u32 2147483648, %v1188_v41 }
  0xcf   : > { %v520_v46 = vsub.f32 1.0, %v519_v42  ;;  %1033 = vpow2.f32 %v941_v43  ;;  %v542_v25 = vand.u32 2147483647, %v1188_v41  ;;  %v374_v43 = vpop.f32.mrf.mxu3 }
  0xd0   : > { %v359_v47 = vpop.f32.mrf.mxu0  ;;  %v545_v37 = vor.u32 1.1754944e-38, %v544_v23 }
  0xd1   : > { %v360_v51 = vadd.f32 %v1142_v12, %v359_v47  ;;  %v521_v52 = vmul.f32 %v1028_v40, %v520_v46  ;;  %vm543_vm1 = vcmp.eq.f32.partialorder %v542_v25, 8.507059e+37 }
  0xd3   : > { %v1030_v57 = vpop.eup %1029  ;;  %v939_v58 = vmul.f32 -1.442695, %v360_v51  ;;  %v522_v60 = vadd.f32 %v1028_v40, %v521_v52 }
  0xd4   : > { %v1205_v61 = vpop.eup %1031  ;;  %v434_v62 = vadd.f32 1.0, %v1030_v57 }
  0xd5   : > { %v534_v1 = vmul.f32 %v1205_v61, %v1188_v41  ;;  %1035 = vpow2.f32 %v939_v58  ;;  %v526_v2 = vsel %vm525_vm8, %v1028_v40, %v522_v60  ;;  %v1034_v7 = vpop.eup %1033  ;;  %vm539_vm11 = vweird.f32 %v1205_v61 }
  0xd6   : > { %1037 = vrcp.f32 %v434_v62  ;;  %v531_v4 = vsel %vm528_vm10, %v530_v0, %v526_v2  ;;  %v1215_v18 = vadd.f32 1.0, %v1034_v7  ;;  %v559_v24 = vand.u32 2147483648, %v434_v62  ;;  %vm1227_vm14 = vmor %vm538_vm12, %vm539_vm11 }
  0xd7   : > { %v685_v5 = vpack.c.bf16 %v531_v4, %v516_v3  ;;  %v535_v6 = vsub.f32 1.0, %v534_v1  ;;  %1039 = vpow2.f32 %v942_v54  ;;  %v557_v27 = vand.u32 2147483647, %v434_v62  ;;  %v376_v57 = vpop.f32.mrf.mxu3 }
  0xd8   : > { %v361_v8 = vpop.f32.mrf.mxu0  ;;  %vm553_vm15 = vweird.f32 %v434_v62  ;;  %v560_v38 = vor.u32 1.1754944e-38, %v559_v24  ;;  %v375_v1 = vadd.f32 %v1142_v12, %v374_v43  ;;  %v377_v3 = vadd.f32 %v1142_v12, %v376_v57 }
  0xd9   : > { %v362_v9 = vadd.f32 %v1142_v12, %v361_v8  ;;  %965 = vmatmul.msk.bf16.gmra.mxu1 %vm727_vm9, %v685_v5  ;;  %v536_v13 = vmul.f32 %v1205_v61, %v535_v6  ;;  %vm558_vm2 = vcmp.eq.f32.partialorder %v557_v27, 8.507059e+37  ;;  %vm598_vm12 = vweird.f32 %v1215_v18 }
  0xda   : > { %v946_v12 = vmul.f32 -1.442695, %v377_v3  ;;  %v604_v22 = vand.u32 2147483648, %v1215_v18 }
  0xdb   : > { %v1036_v10 = vpop.eup %1035  ;;  %v940_v11 = vmul.f32 -1.442695, %v362_v9  ;;  %v537_v20 = vadd.f32 %v1205_v61, %v536_v13  ;;  %v945_v13 = vmul.f32 -1.442695, %v375_v1 }
  0xdc   : > { %v1038_v14 = vpop.eup %1037  ;;  %v1213_v15 = vadd.f32 1.0, %v1036_v10 }
  0xdd   : > { %v549_v17 = vmul.f32 %v1038_v14, %v434_v62  ;;  %1041 = vpow2.f32 %v940_v11  ;;  %v1040_v19 = vpop.eup %1039  ;;  %vm554_vm13 = vweird.f32 %v1038_v14  ;;  %v541_v32 = vsel %vm1227_vm14, %v1205_v61, %v537_v20 }
  0xde   : > { %1043 = vrcp.f32 %v1213_v15  ;;  %v1225_v28 = vadd.f32 1.0, %v1040_v19  ;;  %vm555_vm0 = vmor %vm553_vm15, %vm554_vm13  ;;  %v546_v41 = vsel %vm543_vm1, %v545_v37, %v541_v32  ;;  %vm568_vm4 = vweird.f32 %v1213_v15 }
  0xdf   : > { %v550_v21 = vsub.f32 1.0, %v549_v17  ;;  %1045 = vrcp.f32 %v1215_v18  ;;  %v574_v58 = vand.u32 2147483648, %v1213_v15  ;;  %v572_v61 = vand.u32 2147483647, %v1213_v15 }
  0xe0   : > { %vm613_vm14 = vweird.f32 %v1225_v28  ;;  %v619_v23 = vand.u32 2147483648, %v1225_v28  ;;  %v617_v27 = vand.u32 2147483647, %v1225_v28 }
  0xe1   : > { %v551_v26 = vmul.f32 %v1038_v14, %v550_v21  ;;  %v575_v7 = vor.u32 1.1754944e-38, %v574_v58  ;;  %vm573_vm10 = vcmp.eq.f32.partialorder %v572_v61, 8.507059e+37  ;;  %v602_v21 = vand.u32 2147483647, %v1215_v18 }
  0xe2   : > { %v620_v32 = vor.u32 1.1754944e-38, %v619_v23 }
  0xe3   : > { %v1042_v30 = vpop.eup %1041  ;;  %v552_v33 = vadd.f32 %v1038_v14, %v551_v26 }
  0xe4   : > { %v1044_v34 = vpop.eup %1043  ;;  %v436_v35 = vadd.f32 1.0, %v1042_v30 }
  0xe5   : > { %v564_v39 = vmul.f32 %v1044_v34, %v1213_v15  ;;  %v556_v40 = vsel %vm555_vm0, %v1038_v14, %v552_v33  ;;  %v1237_v47 = vpop.eup %1045  ;;  %vm569_vm3 = vweird.f32 %v1044_v34 }
  0xe6   : > { %1047 = vrcp.f32 %v436_v35  ;;  %v561_v42 = vsel %vm558_vm2, %v560_v38, %v556_v40  ;;  %v594_v53 = vmul.f32 %v1237_v47, %v1215_v18  ;;  %v589_v59 = vand.u32 2147483648, %v436_v35  ;;  %vm1252_vm6 = vmor %vm568_vm4, %vm569_vm3 }
  0xe7   : > { %1049 = vrcp.f32 %v1225_v28  ;;  %v686_v45 = vpack.c.bf16 %v561_v42, %v546_v41  ;;  %v565_v46 = vsub.f32 1.0, %v564_v39  ;;  %v587_v63 = vand.u32 2147483647, %v436_v35 }
  0xe8   : > { %1051 = vpow2.f32 %v943_v36  ;;  %vm583_vm7 = vweird.f32 %v436_v35  ;;  %v590_v8 = vor.u32 1.1754944e-38, %v589_v59  ;;  %v595_v9 = vsub.f32 1.0, %v594_v53 }
  0xe9   : > { %966 = vmatmul.msk.bf16.gmra.mxu1 %vm727_vm9, %v686_v45  ;;  %1053 = vpow2.f32 %v944_v44  ;;  %v566_v48 = vmul.f32 %v1044_v34, %v565_v46  ;;  %vm588_vm11 = vcmp.eq.f32.partialorder %v587_v63, 8.507059e+37  ;;  %vm599_vm13 = vweird.f32 %v1237_v47 }
  0xea   : > { %v596_v17 = vmul.f32 %v1237_v47, %v595_v9  ;;  %vm1274_vm0 = vmor %vm598_vm12, %vm599_vm13  ;;  %vm603_vm2 = vcmp.eq.f32.partialorder %v602_v21, 8.507059e+37  ;;  %v605_v18 = vor.u32 1.1754944e-38, %v604_v22  ;;  %vm618_vm3 = vcmp.eq.f32.partialorder %v617_v27, 8.507059e+37 }
  0xeb   : > { %v567_v54 = vadd.f32 %v1044_v34, %v566_v48 }
  0xec   : > { %v1048_v49 = vpop.eup %1047  ;;  %v597_v20 = vadd.f32 %v1237_v47, %v596_v17 }
  0xed   : > { %v1240_v50 = vpop.eup %1049  ;;  %v579_v51 = vmul.f32 %v1048_v49, %v436_v35  ;;  %vm584_vm5 = vweird.f32 %v1048_v49  ;;  %v571_v4 = vsel %vm1252_vm6, %v1044_v34, %v567_v54 }
  0xee   : > { %v1052_v52 = vpop.eup %1051  ;;  %v609_v56 = vmul.f32 %v1240_v50, %v1225_v28  ;;  %vm585_vm8 = vmor %vm583_vm7, %vm584_vm5  ;;  %v576_v14 = vsel %vm573_vm10, %v575_v7, %v571_v4  ;;  %vm614_vm15 = vweird.f32 %v1240_v50  ;;  %v601_v31 = vsel %vm1274_vm0, %v1237_v47, %v597_v20 }
  0xef   : > { %v580_v55 = vsub.f32 1.0, %v579_v51  ;;  %v1054_v60 = vpop.eup %1053  ;;  %v1249_v0 = vadd.f32 1.0, %v1052_v52  ;;  %vm615_vm1 = vmor %vm613_vm14, %vm614_vm15  ;;  %v606_v38 = vsel %vm603_vm2, %v605_v18, %v601_v31 }
  0xf0   : > { %v1259_v6 = vadd.f32 1.0, %v1054_v60  ;;  %v610_v11 = vsub.f32 1.0, %v609_v56 }
  0xf1   : > { %v581_v62 = vmul.f32 %v1048_v49, %v580_v55  ;;  %1055 = vrcp.f32 %v1249_v0  ;;  %vm628_vm4 = vweird.f32 %v1249_v0  ;;  %v632_v45 = vand.u32 2147483647, %v1249_v0 }
  0xf2   : > { %1057 = vrcp.f32 %v1259_v6  ;;  %v611_v19 = vmul.f32 %v1240_v50, %v610_v11  ;;  %vm643_vm6 = vweird.f32 %v1259_v6  ;;  %v634_v46 = vand.u32 2147483648, %v1249_v0 }
  0xf3   : > { %v582_v5 = vadd.f32 %v1048_v49, %v581_v62  ;;  %1059 = vpow2.f32 %v945_v13  ;;  %v649_v47 = vand.u32 2147483648, %v1259_v6  ;;  %v647_v51 = vand.u32 2147483647, %v1259_v6 }
  0xf4   : > { %1061 = vpow2.f32 %v946_v12  ;;  %v612_v26 = vadd.f32 %v1240_v50, %v611_v19  ;;  %v635_v54 = vor.u32 1.1754944e-38, %v634_v46  ;;  %v1002_v12 = vld [vmem:[%s1343_s4] ss:$0 sm:$0xff] }
  0xf5   : > { %v586_v10 = vsel %vm585_vm8, %v1048_v49, %v582_v5  ;;  %v650_v55 = vor.u32 1.1754944e-38, %v649_v47  ;;  %vm648_vm12 = vcmp.eq.f32.partialorder %v647_v51, 8.507059e+37 }
  0xf6   : > { %v591_v15 = vsel %vm588_vm11, %v590_v8, %v586_v10  ;;  %v616_v36 = vsel %vm615_vm1, %v1240_v50, %v612_v26  ;;  %vm633_vm11 = vcmp.eq.f32.partialorder %v632_v45, 8.507059e+37 }
  0xf7   : > { %v687_v16 = vpack.c.bf16 %v591_v15, %v576_v14  ;;  %v1056_v24 = vpop.eup %1055  ;;  %v621_v39 = vsel %vm618_vm3, %v620_v32, %v616_v36 }
  0xf8   : > { %v1058_v29 = vpop.eup %1057  ;;  %v624_v34 = vmul.f32 %v1056_v24, %v1249_v0  ;;  %v688_v42 = vpack.c.bf16 %v621_v39, %v606_v38  ;;  %vm629_vm5 = vweird.f32 %v1056_v24 }
  0xf9   : > { %967 = vmatmul.msk.bf16.vlgmr.msra.gmra.mxu2 %vm727_vm9, %v687_v16  ;;  %v1060_v30 = vpop.eup %1059  ;;  %v639_v35 = vmul.f32 %v1058_v29, %v1259_v6  ;;  %vm644_vm7 = vweird.f32 %v1058_v29  ;;  %vm630_vm8 = vmor %vm628_vm4, %vm629_vm5  ;;  %vm801_vm5 = vcmask 130048  }
  0xfa   : > { %v1062_v33 = vpop.eup %1061  ;;  %v441_v37 = vadd.f32 1.0, %v1060_v30  ;;  %v625_v40 = vsub.f32 1.0, %v624_v34  ;;  %vm645_vm10 = vmor %vm643_vm6, %vm644_vm7 }
  0xfb   : > { %v442_v28 = vadd.f32 1.0, %v1062_v33  ;;  %v640_v41 = vsub.f32 1.0, %v639_v35 }
  0xfc   : > { %1063 = vrcp.f32 %v441_v37  ;;  %v626_v43 = vmul.f32 %v1056_v24, %v625_v40  ;;  %vm658_vm13 = vweird.f32 %v441_v37  ;;  %v664_v2 = vand.u32 2147483648, %v441_v37 }
  0xfd   : > { %1065 = vrcp.f32 %v442_v28  ;;  %v641_v44 = vmul.f32 %v1058_v29, %v640_v41  ;;  %vm673_vm15 = vweird.f32 %v442_v28  ;;  %v679_v3 = vand.u32 2147483648, %v442_v28 }
  0xfe   : > { %v627_v49 = vadd.f32 %v1056_v24, %v626_v43  ;;  %v662_v5 = vand.u32 2147483647, %v441_v37  ;;  %v677_v7 = vand.u32 2147483647, %v442_v28  ;;  %v665_v8 = vor.u32 1.1754944e-38, %v664_v2 }
  0xff   : > { %v642_v50 = vadd.f32 %v1058_v29, %v641_v44  ;;  %v680_v9 = vor.u32 1.1754944e-38, %v679_v3 }
 0x100   : > { %v631_v57 = vsel %vm630_vm8, %v1056_v24, %v627_v49  ;;  %vm663_vm3 = vcmp.eq.f32.partialorder %v662_v5, 8.507059e+37  ;;  %vm678_vm4 = vcmp.eq.f32.partialorder %v677_v7, 8.507059e+37 }
 0x101   : > { %v646_v58 = vsel %vm645_vm10, %v1058_v29, %v642_v50  ;;  %v636_v59 = vsel %vm633_vm11, %v635_v54, %v631_v57 }
 0x102   : > { %v1064_v48 = vpop.eup %1063  ;;  %v651_v60 = vsel %vm648_vm12, %v650_v55, %v646_v58 }
 0x103   : > { %v1066_v52 = vpop.eup %1065  ;;  %v654_v53 = vmul.f32 %v1064_v48, %v441_v37  ;;  %v689_v63 = vpack.c.bf16 %v651_v60, %v636_v59  ;;  %vm659_vm14 = vweird.f32 %v1064_v48 }
 0x104   : > { %v669_v56 = vmul.f32 %v1066_v52, %v442_v28  ;;  %vm674_vm0 = vweird.f32 %v1066_v52  ;;  %vm660_vm1 = vmor %vm658_vm13, %vm659_vm14 }
 0x105   : > { %v655_v61 = vsub.f32 1.0, %v654_v53  ;;  %vm675_vm2 = vmor %vm673_vm15, %vm674_vm0 }
 0x106   : > { %v670_v62 = vsub.f32 1.0, %v669_v56 }
 0x107   : > { %v656_v0 = vmul.f32 %v1064_v48, %v655_v61 }
 0x108   : > { %v671_v1 = vmul.f32 %v1066_v52, %v670_v62 }
 0x109   : > { %968 = vmatmul.msk.bf16.gmra.mxu2 %vm727_vm9, %v688_v42  ;;  %v657_v4 = vadd.f32 %v1064_v48, %v656_v0 }
 0x10a   : > { %v672_v6 = vadd.f32 %v1066_v52, %v671_v1 }
 0x10b   : > { %v661_v10 = vsel %vm660_vm1, %v1064_v48, %v657_v4 }
 0x10c   : > { %v676_v11 = vsel %vm675_vm2, %v1066_v52, %v672_v6  ;;  %v666_v13 = vsel %vm663_vm3, %v665_v8, %v661_v10 }
 0x10d   : > { %v681_v14 = vsel %vm678_vm4, %v680_v9, %v676_v11 }
 0x10e   : > { %v690_v15 = vpack.c.bf16 %v681_v14, %v666_v13 }
 0x119   : > { %969 = vmatmul.msk.bf16.gmra.mxu2 %vm727_vm9, %v689_v63 }
 0x129   : > { %970 = vmatmul.msk.bf16.gmra.mxu2 %vm727_vm9, %v690_v15 }
 0x136   : > { %v761_v16 = vpop.f32.mrf.mxu1 }
 0x137   : > { %v762_v17 = vadd.f32 %v1002_v12, %v761_v16 }
 0x139   : > { %802 = vst.msk [vmem:[%s1302_s20] sm:$0xff] %vm801_vm5, %v762_v17 }
 0x13e   : > { %v763_v19 = vpop.f32.mrf.mxu1 }
 0x13f   : > { %v764_v20 = vadd.f32 %v1002_v12, %v763_v19 }
 0x141   : > { %803 = vst.msk [vmem:[%s1302_s20 + $0x8] sm:$0xff] %vm801_vm5, %v764_v20 }
 0x146   : > { %v766_v21 = vpop.f32.mrf.mxu1 }
 0x147   : > { %v767_v22 = vadd.f32 %v1002_v12, %v766_v21 }
 0x149   : > { %804 = vst.msk [vmem:[%s1302_s20 + $0x10] sm:$0xff] %vm801_vm5, %v767_v22 }
 0x14e   : > { %v768_v23 = vpop.f32.mrf.mxu1 }
 0x14f   : > { %v769_v24 = vadd.f32 %v1002_v12, %v768_v23 }
 0x151   : > { %805 = vst.msk [vmem:[%s1302_s20 + $0x18] sm:$0xff] %vm801_vm5, %v769_v24 }
 0x156   : > { %v771_v25 = vpop.f32.mrf.mxu1 }
 0x157   : > { %v772_v26 = vadd.f32 %v1002_v12, %v771_v25 }
 0x159   : > { %806 = vst.msk [vmem:[%s1302_s20 + $0x20] sm:$0xff] %vm801_vm5, %v772_v26 }
 0x15e   : > { %v773_v27 = vpop.f32.mrf.mxu1 }
 0x15f   : > { %v774_v29 = vadd.f32 %v1002_v12, %v773_v27 }
 0x161   : > { %807 = vst.msk [vmem:[%s1302_s20 + $0x28] sm:$0xff] %vm801_vm5, %v774_v29 }
 0x166   : > { %v776_v30 = vpop.f32.mrf.mxu1 }
 0x167   : > { %v777_v31 = vadd.f32 %v1002_v12, %v776_v30 }
 0x169   : > { %808 = vst.msk [vmem:[%s1302_s20 + $0x30] sm:$0xff] %vm801_vm5, %v777_v31 }
 0x16e   : > { %v778_v18 = vpop.f32.mrf.mxu1 }
 0x16f   : > { %v779_v32 = vadd.f32 %v1002_v12, %v778_v18 }
 0x171   : > { %809 = vst.msk [vmem:[%s1302_s20 + $0x38] sm:$0xff] %vm801_vm5, %v779_v32 }
 0x17c   : > { %v781_v33 = vpop.f32.mrf.mxu2 }
 0x17d   : > { %v782_v34 = vadd.f32 %v1002_v12, %v781_v33 }
 0x17f   : > { %810 = vst.msk [vmem:[%s1302_s20 + $0x40] sm:$0xff] %vm801_vm5, %v782_v34 }
 0x184   : > { %v783_v35 = vpop.f32.mrf.mxu2 }
 0x185   : > { %v784_v36 = vadd.f32 %v1002_v12, %v783_v35 }
 0x187   : > { %811 = vst.msk [vmem:[%s1302_s20 + $0x48] sm:$0xff] %vm801_vm5, %v784_v36 }
 0x18c   : > { %v786_v37 = vpop.f32.mrf.mxu2 }
 0x18d   : > { %v787_v28 = vadd.f32 %v1002_v12, %v786_v37 }
 0x18f   : > { %812 = vst.msk [vmem:[%s1302_s20 + $0x50] sm:$0xff] %vm801_vm5, %v787_v28 }
 0x194   : > { %v788_v38 = vpop.f32.mrf.mxu2 }
 0x195   : > { %v789_v39 = vadd.f32 %v1002_v12, %v788_v38 }
 0x197   : > { %813 = vst.msk [vmem:[%s1302_s20 + $0x58] sm:$0xff] %vm801_vm5, %v789_v39 }
 0x19c   : > { %v791_v40 = vpop.f32.mrf.mxu2 }
 0x19d   : > { %v792_v41 = vadd.f32 %v1002_v12, %v791_v40 }
 0x19f   : > { %814 = vst.msk [vmem:[%s1302_s20 + $0x60] sm:$0xff] %vm801_vm5, %v792_v41 }
 0x1a4   : > { %v793_v42 = vpop.f32.mrf.mxu2 }
 0x1a5   : > { %v794_v43 = vadd.f32 %v1002_v12, %v793_v42 }
 0x1a7   : > { %815 = vst.msk [vmem:[%s1302_s20 + $0x68] sm:$0xff] %vm801_vm5, %v794_v43 }
 0x1ac   : > { %v796_v44 = vpop.f32.mrf.mxu2 }
 0x1ad   : > { %v797_v45 = vadd.f32 %v1002_v12, %v796_v44 }
 0x1af   : > { %816 = vst.msk [vmem:[%s1302_s20 + $0x70] sm:$0xff] %vm801_vm5, %v797_v45 }
 0x1b4   : > { %v798_v46 = vpop.f32.mrf.mxu2 }
 0x1b5   : > { %v799_v47 = vadd.f32 %v1002_v12, %v798_v46 }
 0x1b7   : > { %817 = vst.msk [vmem:[%s1302_s20 + $0x78] sm:$0xff] %vm801_vm5, %v799_v47 }
 0x1b8 PF: > { %s15_s18 = sadd.s32 1, %s1073_s18  }
 0x1b9   : > { %p12_p4 = scmp.ge.s32.totalorder %s15_s18, 4  }
 0x1bb   :  { %14 = sbr.rel (!%p12_p4) target bundleno = 1 (0x1), region = 70 }

</bundles_post_ra>
